<compile_context>
chip_gen: v7x
topology: tpu7x:2x2x1
jax: 0.10.0
libtpu: 0.0.40
codegen_flags: <defaults>
</compile_context>

<pallas_src>
import jax
import jax.numpy as jnp
from jax.experimental import pallas as pl
from jax.experimental.pallas import tpu as pltpu


def _round_up(x, m):
    return (x + m - 1) // m * m


def denoiser_kernel(lat_ref, txt_ref, w1a_ref, w1b_ref, b1_ref,
                    w2_ref, b2_ref, w3_ref, b3_ref, o_ref):
    # fc1: fused "concat" as two MXU dots against the two row-blocks of W1.
    h1 = jnp.dot(lat_ref[...], w1a_ref[...], preferred_element_type=jnp.float32)
    h1 = h1 + jnp.dot(txt_ref[...], w1b_ref[...], preferred_element_type=jnp.float32)
    h1 = jnp.maximum(h1 + b1_ref[...], 0.0).astype(jnp.bfloat16)   # f32 epilogue, bf16 feed

    # fc2
    h2 = jnp.dot(h1, w2_ref[...], preferred_element_type=jnp.float32) + b2_ref[...]
    h2 = jnp.maximum(h2, 0.0).astype(jnp.bfloat16)

    # fc3 (output columns pre-padded to a lane-dense multiple of 128)
    o_ref[...] = jnp.dot(h2, w3_ref[...], preferred_element_type=jnp.float32) + b3_ref[...]


def prepare_params(raw_params, latent_dim):
    """One-time conversion: bf16 weights, split W1, pad fc3 columns to 128 lanes."""
    w1, b1, w2, b2, w3, b3 = raw_params
    out_dim = w3.shape[1]
    n_pad = _round_up(max(out_dim, 128), 128)

    w1a = w1[:latent_dim].astype(jnp.bfloat16)          # latent rows of W1
    w1b = w1[latent_dim:].astype(jnp.bfloat16)          # text rows of W1
    w2b = w2.astype(jnp.bfloat16)
    w3p = jnp.zeros((w3.shape[0], n_pad), jnp.bfloat16).at[:, :out_dim].set(
        w3.astype(jnp.bfloat16))
    b3p = jnp.zeros((1, n_pad), jnp.float32).at[:, :out_dim].set(b3.astype(jnp.float32))
    return (w1a, w1b, b1.astype(jnp.float32), w2b, b2.astype(jnp.float32),
            w3p, b3p, out_dim)


def denoiser_forward(noisy_latent, text_embedding, params, *, max_tile_b=512):
    w1a, w1b, b1, w2, b2, w3p, b3p, out_dim = params
    B, latent_dim = noisy_latent.shape
    text_dim = text_embedding.shape[1]
    hidden1 = w1a.shape[1]
    hidden2 = w2.shape[1]
    n_pad = w3p.shape[1]

    # Batch tile: multiple of 16 (bf16 sublane pack), capped at max_tile_b.
    tb = min(max_tile_b, _round_up(B, 16))
    b_pad = _round_up(B, tb)

    lat = noisy_latent.astype(jnp.bfloat16)
    txt = text_embedding.astype(jnp.bfloat16)
    if b_pad != B:
        lat = jnp.pad(lat, ((0, b_pad - B), (0, 0)))
        txt = jnp.pad(txt, ((0, b_pad - B), (0, 0)))

    grid = (b_pad // tb,)
    resident = lambda a: pl.BlockSpec(a.shape, lambda i: (0, 0))  # stays in VMEM across grid

    flops = 2 * b_pad * ((latent_dim + text_dim) * hidden1
                         + hidden1 * hidden2 + hidden2 * n_pad)
    bytes_accessed = (
        lat.size * lat.dtype.itemsize + txt.size * txt.dtype.itemsize
        + sum(int(p.size) * p.dtype.itemsize for p in (w1a, w1b, b1, w2, b2, w3p, b3p))
        + b_pad * n_pad * 4
    )

    out = pl.pallas_call(
        denoiser_kernel,
        out_shape=jax.ShapeDtypeStruct((b_pad, n_pad), jnp.float32),
        grid=grid,
        in_specs=[
            pl.BlockSpec((tb, latent_dim), lambda i: (i, 0)),
            pl.BlockSpec((tb, text_dim), lambda i: (i, 0)),
            resident(w1a), resident(w1b), resident(b1),
            resident(w2), resident(b2),
            resident(w3p), resident(b3p),
        ],
        out_specs=pl.BlockSpec((tb, n_pad), lambda i: (i, 0)),
        compiler_params=pltpu.CompilerParams(
            dimension_semantics=("parallel",)),           # shards batch across v7x's 2 TCs
        cost_estimate=pl.CostEstimate(
            flops=flops, transcendentals=0, bytes_accessed=bytes_accessed),
    )(lat, txt, w1a, w1b, b1, w2, b2, w3p, b3p)

    return out[:B, :out_dim]


def init_params(key, latent_dim, text_embedding_dim):
    """Deterministic synthetic init matching nn.Linear shapes (stored as [in, out])."""
    in_dim = latent_dim + text_embedding_dim
    dims = [(in_dim, 512), (512, 256), (256, latent_dim)]
    params = []
    for i, (fan_in, fan_out) in enumerate(dims):
        kw, kb = jax.random.split(jax.random.fold_in(key, i))
        bound = 1.0 / jnp.sqrt(fan_in)
        w = jax.random.uniform(kw, (fan_in, fan_out), jnp.float32, -bound, bound)
        b = jax.random.uniform(kb, (1, fan_out), jnp.float32, -bound, bound)
        params += [w, b]
    return tuple(params)


def reference_forward(noisy_latent, text_embedding, raw_params):
    w1, b1, w2, b2, w3, b3 = raw_params
    x = jnp.concatenate([noisy_latent, text_embedding], axis=1)
    x = jnp.maximum(x @ w1 + b1, 0.0)
    x = jnp.maximum(x @ w2 + b2, 0.0)
    return x @ w3 + b3


if __name__ == "__main__":
    key = jax.random.PRNGKey(0)
    batch = 8
    latent_dim = 32
    text_embedding_dim = 32

    k1, k2, k3 = jax.random.split(key, 3)
    noisy_latent = jax.random.normal(k1, (batch, latent_dim), jnp.float32)
    text_embedding = jax.random.normal(k2, (batch, text_embedding_dim), jnp.float32)
    raw_params = init_params(k3, latent_dim, text_embedding_dim)
    params = prepare_params(raw_params, latent_dim)

    out = denoiser_forward(noisy_latent, text_embedding, params)
    out = jax.block_until_ready(out)

    ref = reference_forward(noisy_latent, text_embedding, raw_params)
    assert out.shape == (batch, latent_dim)
    assert bool(jnp.all(jnp.isfinite(out)))
    # bf16 matmul operands with f32 accumulation -> loose-but-tight-enough tolerance.
    max_err = float(jnp.max(jnp.abs(out - ref)))
    assert jnp.allclose(out, ref, atol=5e-2, rtol=5e-2), f"max abs err {max_err}"
    print("KERNEL_OK")
</pallas_src>

<mosaic_0001>
module attributes {stable_mosaic.version = 11 : i64} {
  func.func @denoiser_kernel(%arg0: i32, %arg1: memref<16x32xbf16, #tpu.memory_space<vmem>>, %arg2: memref<16x32xbf16, #tpu.memory_space<vmem>>, %arg3: memref<32x512xbf16, #tpu.memory_space<vmem>>, %arg4: memref<32x512xbf16, #tpu.memory_space<vmem>>, %arg5: memref<1x512xf32, #tpu.memory_space<vmem>>, %arg6: memref<512x256xbf16, #tpu.memory_space<vmem>>, %arg7: memref<1x256xf32, #tpu.memory_space<vmem>>, %arg8: memref<256x128xbf16, #tpu.memory_space<vmem>>, %arg9: memref<1x128xf32, #tpu.memory_space<vmem>>, %arg10: memref<16x128xf32, #tpu.memory_space<vmem>>) attributes {dimension_semantics = [#tpu.dimension_semantics<parallel>], iteration_bounds = array<i64: 1>, scalar_prefetch = 0 : i64, scratch_operands = 0 : i64, tpu.core_type = #tpu.core_type<tc>, window_params = [{transform_indices = @transform_0, window_bounds = array<i64: 16, 32>}, {transform_indices = @transform_1, window_bounds = array<i64: 16, 32>}, {pipeline_mode = #tpu.pipeline_mode<synchronous>, transform_indices = @transform_2, window_bounds = array<i64: 32, 512>}, {pipeline_mode = #tpu.pipeline_mode<synchronous>, transform_indices = @transform_3, window_bounds = array<i64: 32, 512>}, {pipeline_mode = #tpu.pipeline_mode<synchronous>, transform_indices = @transform_4, window_bounds = array<i64: 1, 512>}, {pipeline_mode = #tpu.pipeline_mode<synchronous>, transform_indices = @transform_5, window_bounds = array<i64: 512, 256>}, {pipeline_mode = #tpu.pipeline_mode<synchronous>, transform_indices = @transform_6, window_bounds = array<i64: 1, 256>}, {pipeline_mode = #tpu.pipeline_mode<synchronous>, transform_indices = @transform_7, window_bounds = array<i64: 256, 128>}, {pipeline_mode = #tpu.pipeline_mode<synchronous>, transform_indices = @transform_8, window_bounds = array<i64: 1, 128>}, {transform_indices = @transform_9, window_bounds = array<i64: 16, 128>}]} {
    %c0 = arith.constant 0 : index
    %c0_0 = arith.constant 0 : index
    %0 = vector.load %arg1[%c0, %c0_0] : memref<16x32xbf16, #tpu.memory_space<vmem>>, vector<16x32xbf16>
    %c0_1 = arith.constant 0 : index
    %c0_2 = arith.constant 0 : index
    %1 = vector.load %arg3[%c0_1, %c0_2] : memref<32x512xbf16, #tpu.memory_space<vmem>>, vector<32x512xbf16>
    %cst = arith.constant dense<0.000000e+00> : vector<16x512xf32>
    %2 = tpu.matmul %0, %1, %cst {dimension_numbers = #tpu.dot_dimension_numbers<[1], [0], [0], [1], [0, 0, 1, 1], [], []>} : vector<16x32xbf16>, vector<32x512xbf16>, vector<16x512xf32> -> vector<16x512xf32>
    %c0_3 = arith.constant 0 : index
    %c0_4 = arith.constant 0 : index
    %3 = vector.load %arg2[%c0_3, %c0_4] : memref<16x32xbf16, #tpu.memory_space<vmem>>, vector<16x32xbf16>
    %c0_5 = arith.constant 0 : index
    %c0_6 = arith.constant 0 : index
    %4 = vector.load %arg4[%c0_5, %c0_6] : memref<32x512xbf16, #tpu.memory_space<vmem>>, vector<32x512xbf16>
    %cst_7 = arith.constant dense<0.000000e+00> : vector<16x512xf32>
    %5 = tpu.matmul %3, %4, %cst_7 {dimension_numbers = #tpu.dot_dimension_numbers<[1], [0], [0], [1], [0, 0, 1, 1], [], []>} : vector<16x32xbf16>, vector<32x512xbf16>, vector<16x512xf32> -> vector<16x512xf32>
    %6 = arith.addf %2, %5 : vector<16x512xf32>
    %c0_8 = arith.constant 0 : index
    %c0_9 = arith.constant 0 : index
    %7 = vector.load %arg5[%c0_8, %c0_9] : memref<1x512xf32, #tpu.memory_space<vmem>>, vector<1x512xf32>
    %8 = vector.broadcast %7 : vector<1x512xf32> to vector<16x512xf32>
    %9 = arith.addf %6, %8 : vector<16x512xf32>
    %cst_10 = arith.constant 0.000000e+00 : f32
    %10 = vector.broadcast %cst_10 : f32 to vector<16x512xf32>
    %11 = arith.maximumf %9, %10 : vector<16x512xf32>
    %12 = arith.truncf %11 : vector<16x512xf32> to vector<16x512xbf16>
    %c0_11 = arith.constant 0 : index
    %c0_12 = arith.constant 0 : index
    %13 = vector.load %arg6[%c0_11, %c0_12] : memref<512x256xbf16, #tpu.memory_space<vmem>>, vector<512x256xbf16>
    %cst_13 = arith.constant dense<0.000000e+00> : vector<16x256xf32>
    %14 = tpu.matmul %12, %13, %cst_13 {dimension_numbers = #tpu.dot_dimension_numbers<[1], [0], [0], [1], [0, 0, 1, 1], [], []>} : vector<16x512xbf16>, vector<512x256xbf16>, vector<16x256xf32> -> vector<16x256xf32>
    %c0_14 = arith.constant 0 : index
    %c0_15 = arith.constant 0 : index
    %15 = vector.load %arg7[%c0_14, %c0_15] : memref<1x256xf32, #tpu.memory_space<vmem>>, vector<1x256xf32>
    %16 = vector.broadcast %15 : vector<1x256xf32> to vector<16x256xf32>
    %17 = arith.addf %14, %16 : vector<16x256xf32>
    %cst_16 = arith.constant 0.000000e+00 : f32
    %18 = vector.broadcast %cst_16 : f32 to vector<16x256xf32>
    %19 = arith.maximumf %17, %18 : vector<16x256xf32>
    %20 = arith.truncf %19 : vector<16x256xf32> to vector<16x256xbf16>
    %c0_17 = arith.constant 0 : index
    %c0_18 = arith.constant 0 : index
    %21 = vector.load %arg8[%c0_17, %c0_18] : memref<256x128xbf16, #tpu.memory_space<vmem>>, vector<256x128xbf16>
    %cst_19 = arith.constant dense<0.000000e+00> : vector<16x128xf32>
    %22 = tpu.matmul %20, %21, %cst_19 {dimension_numbers = #tpu.dot_dimension_numbers<[1], [0], [0], [1], [0, 0, 1, 1], [], []>} : vector<16x256xbf16>, vector<256x128xbf16>, vector<16x128xf32> -> vector<16x128xf32>
    %c0_20 = arith.constant 0 : index
    %c0_21 = arith.constant 0 : index
    %23 = vector.load %arg9[%c0_20, %c0_21] : memref<1x128xf32, #tpu.memory_space<vmem>>, vector<1x128xf32>
    %24 = vector.broadcast %23 : vector<1x128xf32> to vector<16x128xf32>
    %25 = arith.addf %22, %24 : vector<16x128xf32>
    %c0_22 = arith.constant 0 : index
    %c0_23 = arith.constant 0 : index
    %26 = vector.load %arg10[%c0_22, %c0_23] : memref<16x128xf32, #tpu.memory_space<vmem>>, vector<16x128xf32>
    tpu.vector_store %arg10[%c0_22, %c0_23], %25 {strides = array<i32>} : memref<16x128xf32, #tpu.memory_space<vmem>>, vector<16x128xf32>,
    return
  }
  func.func @transform_0(%arg0: i32) -> (i32, i32) {
    %c0_i32 = arith.constant 0 : i32
    %c0_i32_0 = arith.constant 0 : i32
    return %arg0, %c0_i32 : i32, i32
  }
  func.func @transform_1(%arg0: i32) -> (i32, i32) {
    %c0_i32 = arith.constant 0 : i32
    %c0_i32_0 = arith.constant 0 : i32
    return %arg0, %c0_i32 : i32, i32
  }
  func.func @transform_2(%arg0: i32) -> (i32, i32) {
    %c0_i32 = arith.constant 0 : i32
    %c0_i32_0 = arith.constant 0 : i32
    %c0_i32_1 = arith.constant 0 : i32
    return %c0_i32, %c0_i32_0 : i32, i32
  }
  func.func @transform_3(%arg0: i32) -> (i32, i32) {
    %c0_i32 = arith.constant 0 : i32
    %c0_i32_0 = arith.constant 0 : i32
    %c0_i32_1 = arith.constant 0 : i32
    return %c0_i32, %c0_i32_0 : i32, i32
  }
  func.func @transform_4(%arg0: i32) -> (i32, i32) {
    %c0_i32 = arith.constant 0 : i32
    %c0_i32_0 = arith.constant 0 : i32
    %c0_i32_1 = arith.constant 0 : i32
    return %c0_i32, %c0_i32_0 : i32, i32
  }
  func.func @transform_5(%arg0: i32) -> (i32, i32) {
    %c0_i32 = arith.constant 0 : i32
    %c0_i32_0 = arith.constant 0 : i32
    %c0_i32_1 = arith.constant 0 : i32
    return %c0_i32, %c0_i32_0 : i32, i32
  }
  func.func @transform_6(%arg0: i32) -> (i32, i32) {
    %c0_i32 = arith.constant 0 : i32
    %c0_i32_0 = arith.constant 0 : i32
    %c0_i32_1 = arith.constant 0 : i32
    return %c0_i32, %c0_i32_0 : i32, i32
  }
  func.func @transform_7(%arg0: i32) -> (i32, i32) {
    %c0_i32 = arith.constant 0 : i32
    %c0_i32_0 = arith.constant 0 : i32
    %c0_i32_1 = arith.constant 0 : i32
    return %c0_i32, %c0_i32_0 : i32, i32
  }
  func.func @transform_8(%arg0: i32) -> (i32, i32) {
    %c0_i32 = arith.constant 0 : i32
    %c0_i32_0 = arith.constant 0 : i32
    %c0_i32_1 = arith.constant 0 : i32
    return %c0_i32, %c0_i32_0 : i32, i32
  }
  func.func @transform_9(%arg0: i32) -> (i32, i32) {
    %c0_i32 = arith.constant 0 : i32
    %c0_i32_0 = arith.constant 0 : i32
    return %arg0, %c0_i32 : i32, i32
  }
}

</mosaic_0001>

<bundles_post_ra>
// kernel: tpu_custom_call.1
= control target key start
LH: loop header
LB: loop body
LE: loop exit
PB: predicated region body
PF: predicated region fallthrough
CT: control target
= control target key end

     0   :  { %14 = vsyncpa [#allocation3], 0  ;;  %s1786_s0 = inlined_call_operand.hbm [shape: bf16[16,32], index: 0, kind: input, shape index: {}]   ;;  %s1787_s1 = inlined_call_operand.hbm [shape: bf16[16,32], index: 1, kind: input, shape index: {}]   ;;  %s1788_s2 = inlined_call_operand.hbm [shape: bf16[32,512], index: 2, kind: input, shape index: {}]   ;;  %s1789_s3 = inlined_call_operand.hbm [shape: bf16[32,512], index: 3, kind: input, shape index: {}]   ;;  %s1790_s4 = inlined_call_operand.vmem [shape: f32[1,512], index: 4, kind: input, shape index: {}]   ;;  %s1791_s5 = inlined_call_operand.hbm [shape: bf16[512,256], index: 5, kind: input, shape index: {}]   ;;  %s1792_s6 = inlined_call_operand.vmem [shape: f32[1,256], index: 6, kind: input, shape index: {}]   ;;  %s1793_s7 = inlined_call_operand.hbm [shape: bf16[256,128], index: 7, kind: input, shape index: {}]   ;;  %s1794_s8 = inlined_call_operand.vmem [shape: f32[1,128], index: 8, kind: input, shape index: {}]   ;;  %s1795_s9 = inlined_call_operand.hbm [shape: f32[16,128], index: 9, kind: output, shape index: {}]  }
   0x1   :  { %15 = vsyncpa [#allocation6], 0 }
   0x2   :  { %16 = vsyncpa [#allocation9], 0 }
   0x3   :  { %17 = vsyncpa [#allocation12], 0 }
   0x4   :  { %18 = vsyncpa [#allocation4], 0  ;;  %s1590_s30 = smov [#allocation5]   ;;  %s1426_s13 = scalar_lea.hbm %s1787_s1, 128 }
   0x5   :  { %s36_s10 = sshll.u32 %s1590_s30, 4  ;;  %p1427_p0 = scmp.ne.s32.totalorder %s1787_s1, %s1426_s13  ;;  %s37_s10 = int_to_ptr.vmem [resolvable:$true] %s36_s10 }
   0x6   :  { %p1430_p1 = scmp.lt.u32.totalorder %s1426_s13, %s1787_s1 }
   0x8   :  { %p1432_p2 = pnand %p1430_p1, %p1427_p0 }
   0xa   :  { %1435 = shalt.err (!%p1432_p2)
}
   0xb   :  { %s1436_s18 = scalar_lea.vmem %s37_s10, 128  ;;  %p1441_p4 = scmp.lt.s32.totalorder %s37_s10, %s37_s10 }
   0xc   :  { %p1437_p3 = scmp.ne.s32.totalorder %s37_s10, %s1436_s18  ;;  %p1442_p5 = scmp.lt.s32.totalorder %s1436_s18, %s1436_s18 }
   0xe   :  { %p1443_p6 = por %p1442_p5, %p1441_p4 }
  0x10   :  { %p1444_p7 = pnand %p1443_p6, %p1437_p3 }
  0x12   :  { %1447 = shalt.err (!%p1444_p7)
}
  0x13   :  { %s1591_s19 = smov 64   ;;  %s1592_s20 = smov 4  }
  0x14   :  { %42 = dma.hbm_to_vmem [thread:$0]  %s1787_s1, 128, %s37_s10, [#allocation6], %s1591_s19, %s1591_s19, %s1592_s20  }
  0x15   :  { %s1593_s23 = smov [#allocation8]   ;;  %s1594_s25 = smov [#allocation2]  }
  0x16   :  { %s60_s24 = sshll.u32 %s1593_s23, 4  ;;  %s24_s26 = sshll.u32 %s1594_s25, 4  ;;  %s61_s24 = int_to_ptr.vmem [resolvable:$true] %s60_s24  ;;  %s25_s26 = int_to_ptr.vmem [resolvable:$true] %s24_s26 }
  0x17   :  { %s1448_s29 = scalar_lea.hbm %s1789_s3, 1024 }
  0x18   :  { %p1449_p8 = scmp.ne.s32.totalorder %s1789_s3, %s1448_s29  ;;  %p1452_p9 = scmp.lt.u32.totalorder %s1448_s29, %s1789_s3 }
  0x1a   :  { %p1454_p10 = pnand %p1452_p9, %p1449_p8 }
  0x1c   :  { %1457 = shalt.err (!%p1454_p10)
}
  0x1d   :  { %s1458_s1 = scalar_lea.vmem %s61_s24, 1024  ;;  %p1463_p12 = scmp.lt.s32.totalorder %s61_s24, %s61_s24 }
  0x1e   :  { %p1459_p11 = scmp.ne.s32.totalorder %s61_s24, %s1458_s1  ;;  %p1464_p13 = scmp.lt.s32.totalorder %s1458_s1, %s1458_s1 }
  0x20   :  { %p1465_p0 = por %p1464_p13, %p1463_p12 }
  0x22   :  { %p1466_p1 = pnand %p1465_p0, %p1459_p11 }
  0x24   :  { %1469 = shalt.err (!%p1466_p1)
}
  0x25   :  { %s1595_s10 = smov 256   ;;  %s1596_s14 = smov 16  }
  0x26   :  { %66 = dma.hbm_to_vmem [thread:$0]  %s1789_s3, 1024, %s61_s24, [#allocation9], %s1595_s10, %s1595_s10, %s1596_s14  }
  0x27   :  { %s1470_s21 = scalar_lea.hbm %s1786_s0, 128 }
  0x28   :  { %p1471_p2 = scmp.ne.s32.totalorder %s1786_s0, %s1470_s21  ;;  %p1474_p3 = scmp.lt.u32.totalorder %s1470_s21, %s1786_s0 }
  0x2a   :  { %p1476_p4 = pnand %p1474_p3, %p1471_p2 }
  0x2c   :  { %1479 = shalt.err (!%p1476_p4)
}
  0x2d   :  { %s1480_s28 = scalar_lea.vmem %s25_s26, 128  ;;  %p1485_p6 = scmp.lt.s32.totalorder %s25_s26, %s25_s26 }
  0x2e   :  { %p1481_p5 = scmp.ne.s32.totalorder %s25_s26, %s1480_s28  ;;  %p1486_p7 = scmp.lt.s32.totalorder %s1480_s28, %s1480_s28 }
  0x30   :  { %p1487_p8 = por %p1486_p7, %p1485_p6 }
  0x32   :  { %p1488_p9 = pnand %p1487_p8, %p1481_p5 }
  0x34   :  { %1491 = shalt.err (!%p1488_p9)
}
  0x35   :  { %30 = dma.hbm_to_vmem [thread:$0]  %s1786_s0, 128, %s25_s26, [#allocation3], %s1591_s19, %s1591_s19, %s1592_s20  }
  0x36   :  { %s1597_s29 = smov [#allocation7]   ;;  %s1598_s11 = smov [#allocation10]  }
  0x37   :  { %s48_s30 = sshll.u32 %s1597_s29, 4  ;;  %s74_s12 = sshll.u32 %s1598_s11, 4  ;;  %s49_s30 = int_to_ptr.vmem [resolvable:$true] %s48_s30  ;;  %s75_s12 = int_to_ptr.vmem [resolvable:$true] %s74_s12 }
  0x38   :  { %s1492_s15 = scalar_lea.hbm %s1788_s2, 1024 }
  0x39   :  { %p1493_p10 = scmp.ne.s32.totalorder %s1788_s2, %s1492_s15  ;;  %p1496_p11 = scmp.lt.u32.totalorder %s1492_s15, %s1788_s2 }
  0x3b   :  { %p1498_p12 = pnand %p1496_p11, %p1493_p10 }
  0x3d   :  { %1501 = shalt.err (!%p1498_p12)
}
  0x3e   :  { %s1502_s0 = scalar_lea.vmem %s49_s30, 1024  ;;  %p1507_p0 = scmp.lt.s32.totalorder %s49_s30, %s49_s30 }
  0x3f   :  { %p1503_p13 = scmp.ne.s32.totalorder %s49_s30, %s1502_s0  ;;  %p1508_p1 = scmp.lt.s32.totalorder %s1502_s0, %s1502_s0 }
  0x41   :  { %p1509_p2 = por %p1508_p1, %p1507_p0 }
  0x43   :  { %p1510_p3 = pnand %p1509_p2, %p1503_p13 }
  0x45   :  { %1513 = shalt.err (!%p1510_p3)
}
  0x46   :  { %54 = dma.hbm_to_vmem [thread:$0]  %s1788_s2, 1024, %s49_s30, [#allocation6], %s1595_s10, %s1595_s10, %s1596_s14  }
  0x47   :  { %s1514_s27 = scalar_lea.hbm %s1791_s5, 8192 }
  0x48   :  { %p1515_p4 = scmp.ne.s32.totalorder %s1791_s5, %s1514_s27  ;;  %p1518_p5 = scmp.lt.u32.totalorder %s1514_s27, %s1791_s5 }
  0x4a   :  { %p1520_p6 = pnand %p1518_p5, %p1515_p4 }
  0x4c   :  { %1523 = shalt.err (!%p1520_p6)
}
  0x4d   :  { %s1524_s11 = scalar_lea.vmem %s75_s12, 8192  ;;  %p1529_p8 = scmp.lt.s32.totalorder %s75_s12, %s75_s12 }
  0x4e   :  { %p1525_p7 = scmp.ne.s32.totalorder %s75_s12, %s1524_s11  ;;  %p1530_p9 = scmp.lt.s32.totalorder %s1524_s11, %s1524_s11 }
  0x50   :  { %p1531_p10 = por %p1530_p9, %p1529_p8 }
  0x52   :  { %p1532_p11 = pnand %p1531_p10, %p1525_p7 }
  0x54   :  { %1535 = shalt.err (!%p1532_p11)
}
  0x55   :  { %s1599_s2 = smov 128   ;;  %s1600_s10 = smov 8  }
  0x56   :  { %80 = dma.hbm_to_vmem [thread:$0]  %s1791_s5, 8192, %s75_s12, [#allocation9], %s1599_s2, %s1599_s2, %s1600_s10  }
  0x57   :  { %s1601_s13 = smov [#allocation11]   ;;  %s1536_s17 = scalar_lea.hbm %s1793_s7, 2048 }
  0x58   :  { %s88_s1 = sshll.u32 %s1601_s13, 4  ;;  %p1537_p12 = scmp.ne.s32.totalorder %s1793_s7, %s1536_s17  ;;  %s89_s1 = int_to_ptr.vmem [resolvable:$true] %s88_s1 }
  0x59   :  { %p1540_p13 = scmp.lt.u32.totalorder %s1536_s17, %s1793_s7 }
  0x5b   :  { %p1542_p0 = pnand %p1540_p13, %p1537_p12 }
  0x5d   :  { %1545 = shalt.err (!%p1542_p0)
}
  0x5e   :  { %s1546_s22 = scalar_lea.vmem %s89_s1, 2048  ;;  %p1551_p2 = scmp.lt.s32.totalorder %s89_s1, %s89_s1 }
  0x5f   :  { %p1547_p1 = scmp.ne.s32.totalorder %s89_s1, %s1546_s22  ;;  %p1552_p3 = scmp.lt.s32.totalorder %s1546_s22, %s1546_s22 }
  0x61   :  { %p1553_p4 = por %p1552_p3, %p1551_p2 }
  0x63   :  { %p1554_p5 = pnand %p1553_p4, %p1547_p1 }
  0x65   :  { %1557 = shalt.err (!%p1554_p5)
}
  0x66   :  { %94 = dma.hbm_to_vmem [thread:$0]  %s1793_s7, 2048, %s89_s1, [#allocation12], %s1591_s19, %s1591_s19, %s1592_s20  }
  0x67   :  { %1580 = dma.done.wait [#allocation3], 128  }
  0x68   :  { %1581 = vsyncadd [#allocation3], 4294967168 }
  0x69   :  { %1582 = dma.done.wait [#allocation6], 1152  }
  0x6a   :  { %1583 = vsyncadd [#allocation6], 4294966144 }
  0x6b   :  { %1584 = dma.done.wait [#allocation9], 9216  }
  0x6c   :  { %1585 = vsyncadd [#allocation9], 4294958080 }
  0x6d   :  { %1586 = dma.done.wait [#allocation12], 2048  }
  0x6e   :  { %1587 = vsyncadd [#allocation12], 4294965248  ;;  %v1602_v0 = vmov 0   ;;  %v1288_v1 = vld [vmem:[#allocation8 + $0x4] ss:$16 sps:$4 sm:$0xff]   ;;  %v1294_v6 = vld [vmem:[#allocation5] sm:$0xff]  }
  0x6f   :  { %217 = vmatprep.mubr.bf16.mxu0 %v1602_v0  ;;  %v1290_v2 = vld [vmem:[#allocation8] ss:$16 sps:$4 sm:$0xff]   ;;  %185 = vmatprep.subr.bf16.mxu0 %v1288_v1  ;;  %v1291_v3 = vld [vmem:[#allocation8 + $0x24] ss:$16 sps:$4 sm:$0xff]   ;;  %v1297_v5 = vld [vmem:[#allocation8 + $0xc] ss:$16 sps:$4 sm:$0xff]  }
  0x70   :  { %186 = vmatpush1.bf16.msra.mxu0 %v1290_v2  ;;  %v1293_v4 = vld [vmem:[#allocation8 + $0x20] ss:$16 sps:$4 sm:$0xff]   ;;  %vm181_vm0 = vcmask 261120   ;;  %v1295_v7 = vld [vmem:[#allocation8 + $0x8] ss:$16 sps:$4 sm:$0xff]   ;;  %s1603_s25 = smov [#allocation13]  }
  0x71   :  { %187 = vmatprep.subr.bf16.mxu0 %v1291_v3  ;;  %v1300_v8 = vld [vmem:[#allocation8 + $0x2c] ss:$16 sps:$4 sm:$0xff]   ;;  %v1298_v9 = vld [vmem:[#allocation8 + $0x28] ss:$16 sps:$4 sm:$0xff]   ;;  %v1303_v10 = vld [vmem:[#allocation7 + $0x4] ss:$16 sps:$4 sm:$0xff]  }
  0x72   :  { %v1301_v11 = vld [vmem:[#allocation7] ss:$16 sps:$4 sm:$0xff]   ;;  %v1314_v12 = vld [vmem:[#allocation10 + $0x4] ss:$8 sps:$4 sm:$0xff]   ;;  %v1317_v14 = vld [vmem:[#allocation10 + $0x14] ss:$8 sps:$4 sm:$0xff]  }
  0x73   :  { %v1316_v13 = vld [vmem:[#allocation10] ss:$8 sps:$4 sm:$0xff]   ;;  %v1306_v15 = vld [vmem:[#allocation7 + $0x24] ss:$16 sps:$4 sm:$0xff]   ;;  %843 = vmatprep.subr.bf16.mxu1 %v1314_v12  ;;  %v1319_v16 = vld [vmem:[#allocation10 + $0x10] ss:$8 sps:$4 sm:$0xff]  }
  0x74   :  { %188 = vmatpush1.bf16.msra.mxu0 %v1293_v4  ;;  %844 = vmatpush1.bf16.msra.mxu1 %v1316_v13  ;;  %v1320_v17 = vld [vmem:[#allocation10 + $0x24] ss:$8 sps:$4 sm:$0xff]   ;;  %v1304_v18 = vld [vmem:[#allocation7 + $0x20] ss:$16 sps:$4 sm:$0xff]   ;;  %v1326_v21 = vld [vmem:[#allocation10 + $0x34] ss:$8 sps:$4 sm:$0xff]  }
  0x75   :  { %228 = vmatprep.subr.bf16.mxu0 %v1297_v5  ;;  %845 = vmatprep.subr.bf16.mxu1 %v1317_v14  ;;  %v1310_v19 = vld [vmem:[#allocation7 + $0xc] ss:$16 sps:$4 sm:$0xff]   ;;  %v1325_v20 = vld [vmem:[#allocation10 + $0x20] ss:$8 sps:$4 sm:$0xff]   ;;  %v1307_v22 = vld [vmem:[#allocation2] sm:$0xff]   ;;  %s1118_s27 = sshll.u32 %s1603_s25, 4  ;;  %s1119_s27 = int_to_ptr.vmem [resolvable:$true] %s1118_s27 }
  0x76   :  { %v1308_v23 = vld [vmem:[#allocation7 + $0x8] ss:$16 sps:$4 sm:$0xff]   ;;  %v1313_v24 = vld [vmem:[#allocation7 + $0x2c] ss:$16 sps:$4 sm:$0xff]   ;;  %s1558_s28 = scalar_lea.vmem %s1119_s27, 256  ;;  %p1563_p7 = scmp.lt.s32.totalorder %s1119_s27, %s1119_s27 }
  0x77   :  { %1142 = vmatmul.mubr.msk.bf16.vlgmr.msra.gmra.mrb[0].mxu0 %vm181_vm0, %v1294_v6  ;;  %v1331_v25 = vld [vmem:[#allocation10 + $0x30] ss:$8 sps:$4 sm:$0xff]   ;;  %v1332_v26 = vld [vmem:[#allocation10 + $0x44] ss:$8 sps:$4 sm:$0xff]   ;;  %v1337_v29 = vld [vmem:[#allocation10 + $0x40] ss:$8 sps:$4 sm:$0xff]   ;;  %p1559_p6 = scmp.ne.s32.totalorder %s1119_s27, %s1558_s28  ;;  %p1564_p8 = scmp.lt.s32.totalorder %s1558_s28, %s1558_s28 }
  0x78   :  { %229 = vmatpush1.bf16.msra.mxu0 %v1295_v7  ;;  %260 = vmatprep.mubr.bf16.mxu0 %v1602_v0  ;;  %v1311_v27 = vld [vmem:[#allocation7 + $0x28] ss:$16 sps:$4 sm:$0xff]   ;;  %v1324_v28 = vld [vmem:[#allocation10 + $0x104] ss:$8 sps:$4 sm:$0xff]   ;;  %v1338_v30 = vld [vmem:[#allocation10 + $0x54] ss:$8 sps:$4 sm:$0xff]  }
  0x79   :  { %230 = vmatprep.subr.bf16.mxu0 %v1300_v8  ;;  %846 = vmatpush1.bf16.msra.mxu1 %v1319_v16  ;;  %v1322_v31 = vld [vmem:[#allocation10 + $0x100] ss:$8 sps:$4 sm:$0xff]   ;;  %v1330_v32 = vld [vmem:[#allocation10 + $0x114] ss:$8 sps:$4 sm:$0xff]   ;;  %v1343_v33 = vld [vmem:[#allocation10 + $0x50] ss:$8 sps:$4 sm:$0xff]   ;;  %p1565_p9 = por %p1564_p8, %p1563_p7 }
  0x7a   :  { %847 = vmatprep.subr.bf16.mxu1 %v1320_v17  ;;  %v1344_v34 = vld [vmem:[#allocation10 + $0x64] ss:$8 sps:$4 sm:$0xff]   ;;  %v1328_v35 = vld [vmem:[#allocation10 + $0x110] ss:$8 sps:$4 sm:$0xff]   ;;  %v1349_v37 = vld [vmem:[#allocation10 + $0x60] ss:$8 sps:$4 sm:$0xff]  }
  0x7b   :  { %v1336_v36 = vld [vmem:[#allocation10 + $0x124] ss:$8 sps:$4 sm:$0xff]   ;;  %v1350_v38 = vld [vmem:[#allocation10 + $0x74] ss:$8 sps:$4 sm:$0xff]   ;;  %v1334_v39 = vld [vmem:[#allocation10 + $0x120] ss:$8 sps:$4 sm:$0xff]   ;;  %p1566_p10 = pnand %p1565_p9, %p1559_p6 }
  0x7c   :  { %231 = vmatpush1.bf16.msra.mxu0 %v1298_v9  ;;  %v1342_v40 = vld [vmem:[#allocation10 + $0x134] ss:$8 sps:$4 sm:$0xff]   ;;  %v1355_v41 = vld [vmem:[#allocation10 + $0x70] ss:$8 sps:$4 sm:$0xff]   ;;  %v1356_v42 = vld [vmem:[#allocation10 + $0x84] ss:$8 sps:$4 sm:$0xff]  }
  0x7d   :  { %319 = vmatprep.subr.bf16.mxu0 %v1303_v10  ;;  %848 = vmatpush1.bf16.msra.mxu1 %v1325_v20  ;;  %v1340_v43 = vld [vmem:[#allocation10 + $0x130] ss:$8 sps:$4 sm:$0xff]   ;;  %v1348_v44 = vld [vmem:[#allocation10 + $0x144] ss:$8 sps:$4 sm:$0xff]   ;;  %v1361_v45 = vld [vmem:[#allocation10 + $0x80] ss:$8 sps:$4 sm:$0xff]   ;;  %v407_v20 = vlaneseq }
  0x7e   :  { %849 = vmatprep.subr.bf16.mxu1 %v1326_v21  ;;  %v1346_v46 = vld [vmem:[#allocation10 + $0x140] ss:$8 sps:$4 sm:$0xff]   ;;  %v1362_v47 = vld [vmem:[#allocation10 + $0x94] ss:$8 sps:$4 sm:$0xff]   ;;  %v1367_v49 = vld [vmem:[#allocation10 + $0x90] ss:$8 sps:$4 sm:$0xff]  }
  0x7f   :  { %1143 = vmatmul.mubr.msk.bf16.vlgmr.msra.gmra.mrb[4].mxu0 %vm181_vm0, %v1294_v6  ;;  %v1354_v48 = vld [vmem:[#allocation10 + $0x154] ss:$8 sps:$4 sm:$0xff]   ;;  %v1368_v50 = vld [vmem:[#allocation10 + $0xa4] ss:$8 sps:$4 sm:$0xff]   ;;  %v1352_v51 = vld [vmem:[#allocation10 + $0x150] ss:$8 sps:$4 sm:$0xff]  }
  0x80   :  { %320 = vmatpush1.bf16.msra.mxu0 %v1301_v11  ;;  %351 = vmatprep.mubr.bf16.mxu0 %v1602_v0  ;;  %v1360_v52 = vld [vmem:[#allocation10 + $0x164] ss:$8 sps:$4 sm:$0xff]   ;;  %v1373_v53 = vld [vmem:[#allocation10 + $0xa0] ss:$8 sps:$4 sm:$0xff]   ;;  %v1374_v54 = vld [vmem:[#allocation10 + $0xb4] ss:$8 sps:$4 sm:$0xff]  }
  0x81   :  { %321 = vmatprep.subr.bf16.mxu0 %v1306_v15  ;;  %850 = vmatpush1.bf16.msra.mxu1 %v1331_v25  ;;  %v1358_v55 = vld [vmem:[#allocation10 + $0x160] ss:$8 sps:$4 sm:$0xff]   ;;  %v1366_v56 = vld [vmem:[#allocation10 + $0x174] ss:$8 sps:$4 sm:$0xff]   ;;  %v1379_v57 = vld [vmem:[#allocation10 + $0xb0] ss:$8 sps:$4 sm:$0xff]  }
  0x82   :  { %851 = vmatprep.subr.bf16.mxu1 %v1332_v26  ;;  %v1380_v58 = vld [vmem:[#allocation10 + $0xc4] ss:$8 sps:$4 sm:$0xff]   ;;  %v1364_v59 = vld [vmem:[#allocation10 + $0x170] ss:$8 sps:$4 sm:$0xff]   ;;  %v1385_v61 = vld [vmem:[#allocation10 + $0xc0] ss:$8 sps:$4 sm:$0xff]  }
  0x83   :  { %v1372_v60 = vld [vmem:[#allocation10 + $0x184] ss:$8 sps:$4 sm:$0xff]   ;;  %v1386_v62 = vld [vmem:[#allocation10 + $0xd4] ss:$8 sps:$4 sm:$0xff]   ;;  %v1370_v63 = vld [vmem:[#allocation10 + $0x180] ss:$8 sps:$4 sm:$0xff]  }
  0x84   :  { %322 = vmatpush1.bf16.msra.mxu0 %v1304_v18  ;;  %v1376_v1 = vld [vmem:[#allocation10 + $0x190] ss:$8 sps:$4 sm:$0xff]   ;;  %v1384_v2 = vld [vmem:[#allocation10 + $0x1a4] ss:$8 sps:$4 sm:$0xff]   ;;  %v1382_v3 = vld [vmem:[#allocation10 + $0x1a0] ss:$8 sps:$4 sm:$0xff]  }
  0x85   :  { %362 = vmatprep.subr.bf16.mxu0 %v1310_v19  ;;  %852 = vmatpush1.bf16.msra.mxu1 %v1337_v29  ;;  %v1390_v4 = vld [vmem:[#allocation10 + $0x1b4] ss:$8 sps:$4 sm:$0xff]   ;;  %v1388_v5 = vld [vmem:[#allocation10 + $0x1b0] ss:$8 sps:$4 sm:$0xff]   ;;  %v1392_v7 = vld [vmem:[#allocation10 + $0xe4] ss:$8 sps:$4 sm:$0xff]  }
  0x86   :  { %853 = vmatprep.subr.bf16.mxu1 %v1338_v30  ;;  %v1391_v6 = vld [vmem:[#allocation10 + $0xd0] ss:$8 sps:$4 sm:$0xff]   ;;  %v1396_v8 = vld [vmem:[#allocation10 + $0x1c4] ss:$8 sps:$4 sm:$0xff]   ;;  %v1394_v9 = vld [vmem:[#allocation10 + $0x1c0] ss:$8 sps:$4 sm:$0xff]  }
  0x87   :  { %1153 = vmatmul.mubr.msk.bf16.vlgmr.msra.gmra.mrb[0].mxu0 %vm181_vm0, %v1307_v22  ;;  %v1397_v10 = vld [vmem:[#allocation10 + $0xe0] ss:$8 sps:$4 sm:$0xff]   ;;  %v1398_v11 = vld [vmem:[#allocation10 + $0xf4] ss:$8 sps:$4 sm:$0xff]   ;;  %v1400_v13 = vld [vmem:[#allocation10 + $0x1d0] ss:$8 sps:$4 sm:$0xff]  }
  0x88   :  { %363 = vmatpush1.bf16.msra.mxu0 %v1308_v23  ;;  %394 = vmatprep.mubr.bf16.mxu0 %v1602_v0  ;;  %v1378_v0 = vld [vmem:[#allocation10 + $0x194] ss:$8 sps:$4 sm:$0xff]   ;;  %v1403_v14 = vld [vmem:[#allocation10 + $0xf0] ss:$8 sps:$4 sm:$0xff]   ;;  %v1406_v15 = vld [vmem:[#allocation10 + $0x1e4] ss:$8 sps:$4 sm:$0xff]  }
  0x89   :  { %364 = vmatprep.subr.bf16.mxu0 %v1313_v24  ;;  %854 = vmatpush1.bf16.msra.mxu1 %v1343_v33  ;;  %v1402_v12 = vld [vmem:[#allocation10 + $0x1d4] ss:$8 sps:$4 sm:$0xff]   ;;  %v1404_v16 = vld [vmem:[#allocation10 + $0x1e0] ss:$8 sps:$4 sm:$0xff]   ;;  %v1407_v18 = vld [vmem:[#allocation10 + $0x1f0] ss:$8 sps:$4 sm:$0xff]  }
  0x8a   :  { %855 = vmatprep.subr.bf16.mxu1 %v1344_v34  ;;  %v1409_v17 = vld [vmem:[#allocation10 + $0x1f4] ss:$8 sps:$4 sm:$0xff]   ;;  %v1410_v19 = vld [vmem:[#allocation11 + $0x40] sm:$0xff]   ;;  %v1748_v21 = vshrl.u32 %v407_v20, 7  ;;  %v405_v23 = vld [vmem:[%s1790_s4] sm:$0xf] }
  0x8c   :  { %365 = vmatpush1.bf16.msra.mxu0 %v1311_v27  ;;  %v413_v24 = vsub.s32 1, %v1748_v21  ;;  %v417_v30 = vsub.s32 2, %v1748_v21  ;;  %v421_v33 = vsub.s32 3, %v1748_v21 }
  0x8d   :  { %886 = vmatprep.subr.bf16.mxu0 %v1324_v28  ;;  %856 = vmatpush1.bf16.msra.mxu1 %v1349_v37 }
  0x8e   :  { %857 = vmatprep.subr.bf16.mxu1 %v1350_v38  ;;  %v414_v26 = vrot.slane %v405_v23, %v413_v24 }
  0x8f   :  { %1154 = vmatmul.mubr.msk.bf16.vlgmr.msra.gmra.mrb[4].mxu0 %vm181_vm0, %v1307_v22  ;;  %v409_v22 = vsub.s32 0, %v1748_v21 }
  0x90   :  { %887 = vmatpush1.bf16.msra.mxu0 %v1322_v31 }
  0x91   :  { %888 = vmatprep.subr.bf16.mxu0 %v1330_v32  ;;  %858 = vmatpush1.bf16.msra.mxu1 %v1355_v41  ;;  %v410_v25 = vrot.slane %v405_v23, %v409_v22 }
  0x92   :  { %859 = vmatprep.subr.bf16.mxu1 %v1356_v42  ;;  %v422_v42 = vrot.slane %v405_v23, %v421_v33 }
  0x94   :  { %889 = vmatpush1.bf16.msra.mxu0 %v1328_v35 }
  0x95   :  { %890 = vmatprep.subr.bf16.mxu0 %v1336_v36  ;;  %860 = vmatpush1.bf16.msra.mxu1 %v1361_v45 }
  0x96   :  { %861 = vmatprep.subr.bf16.mxu1 %v1362_v47 }
  0x98   :  { %891 = vmatpush1.bf16.msra.mxu0 %v1334_v39  ;;  %v418_v39 = vrot.slane %v405_v23, %v417_v30 }
  0x99   :  { %892 = vmatprep.subr.bf16.mxu0 %v1342_v40  ;;  %862 = vmatpush1.bf16.msra.mxu1 %v1367_v49  ;;  %v1412_v49 = vld [vmem:[#allocation11 + $0x48] sm:$0xff]  }
  0x9a   :  { %863 = vmatprep.subr.bf16.mxu1 %v1368_v50 }
  0x9c   :  { %893 = vmatpush1.bf16.msra.mxu0 %v1340_v43 }
  0x9d   :  { %894 = vmatprep.subr.bf16.mxu0 %v1348_v44  ;;  %864 = vmatpush1.bf16.msra.mxu1 %v1373_v53 }
  0x9e   :  { %865 = vmatprep.subr.bf16.mxu1 %v1374_v54 }
  0xa0   :  { %895 = vmatpush1.bf16.msra.mxu0 %v1346_v46  ;;  %v1411_v46 = vld [vmem:[#allocation11] sm:$0xff]  }
  0xa1   :  { %896 = vmatprep.subr.bf16.mxu0 %v1354_v48  ;;  %866 = vmatpush1.bf16.msra.mxu1 %v1379_v57 }
  0xa2   :  { %867 = vmatprep.subr.bf16.mxu1 %v1380_v58  ;;  %v1414_v58 = vld [vmem:[#allocation11 + $0x50] sm:$0xff]  }
  0xa4   :  { %897 = vmatpush1.bf16.msra.mxu0 %v1352_v51 }
  0xa5   :  { %898 = vmatprep.subr.bf16.mxu0 %v1360_v52  ;;  %868 = vmatpush1.bf16.msra.mxu1 %v1385_v61 }
  0xa6   :  { %869 = vmatprep.subr.bf16.mxu1 %v1386_v62 }
  0xa8   :  { %899 = vmatpush1.bf16.msra.mxu0 %v1358_v55  ;;  %v1413_v55 = vld [vmem:[#allocation11 + $0x8] sm:$0xff]  }
  0xa9   :  { %900 = vmatprep.subr.bf16.mxu0 %v1366_v56  ;;  %870 = vmatpush1.bf16.msra.mxu1 %v1391_v6  ;;  %v1422_v6 = vld [vmem:[#allocation11 + $0x70] sm:$0xff]  }
  0xaa   :  { %871 = vmatprep.subr.bf16.mxu1 %v1392_v7  ;;  %v1423_v7 = vld [vmem:[#allocation11 + $0x30] sm:$0xff]  }
  0xac   :  { %901 = vmatpush1.bf16.msra.mxu0 %v1364_v59 }
  0xad   :  { %902 = vmatprep.subr.bf16.mxu0 %v1372_v60  ;;  %872 = vmatpush1.bf16.msra.mxu1 %v1397_v10  ;;  %v511_v10 = vld [vmem:[%s1792_s6] sm:$0x3] }
  0xae   :  { %873 = vmatprep.subr.bf16.mxu1 %v1398_v11  ;;  %v516_v11 = vrot.slane %v511_v10, %v409_v22 }
  0xb0   :  { %903 = vmatpush1.bf16.msra.mxu0 %v1370_v63  ;;  %v1415_v63 = vld [vmem:[#allocation11 + $0x10] sm:$0xff]  }
  0xb1   :  { %904 = vmatprep.subr.bf16.mxu0 %v1378_v0  ;;  %874 = vmatpush1.bf16.msra.mxu1 %v1403_v14  ;;  %v1416_v0 = vld [vmem:[#allocation11 + $0x58] sm:$0xff]  }
  0xb2   :  { %1236 = vmatprep.subr.bf16.mxu1 %v1410_v19 }
  0xb4   :  { %905 = vmatpush1.bf16.msra.mxu0 %v1376_v1  ;;  %v1417_v1 = vld [vmem:[#allocation11 + $0x18] sm:$0xff]  }
  0xb5   :  { %906 = vmatprep.subr.bf16.mxu0 %v1384_v2  ;;  %v1418_v2 = vld [vmem:[#allocation11 + $0x60] sm:$0xff]  }
  0xb8   :  { %907 = vmatpush1.bf16.msra.mxu0 %v1382_v3  ;;  %v1419_v3 = vld [vmem:[#allocation11 + $0x20] sm:$0xff]  }
  0xb9   :  { %908 = vmatprep.subr.bf16.mxu0 %v1390_v4  ;;  %v1420_v4 = vld [vmem:[#allocation11 + $0x68] sm:$0xff]  }
  0xbc   :  { %909 = vmatpush1.bf16.msra.mxu0 %v1388_v5  ;;  %v1421_v5 = vld [vmem:[#allocation11 + $0x28] sm:$0xff]  }
  0xbd   :  { %910 = vmatprep.subr.bf16.mxu0 %v1396_v8  ;;  %v1424_v8 = vld [vmem:[#allocation11 + $0x78] sm:$0xff]  }
  0xc0   :  { %911 = vmatpush1.bf16.msra.mxu0 %v1394_v9  ;;  %v1425_v9 = vld [vmem:[#allocation11 + $0x38] sm:$0xff]  }
  0xc1   :  { %912 = vmatprep.subr.bf16.mxu0 %v1402_v12 }
  0xc4   :  { %913 = vmatpush1.bf16.msra.mxu0 %v1400_v13 }
  0xc5   :  { %914 = vmatprep.subr.bf16.mxu0 %v1406_v15 }
  0xc8   :  { %915 = vmatpush1.bf16.msra.mxu0 %v1404_v16 }
  0xc9   :  { %916 = vmatprep.subr.bf16.mxu0 %v1409_v17 }
  0xcc   :  { %917 = vmatpush1.bf16.msra.mxu0 %v1407_v18  ;;  %v520_v18 = vrot.slane %v511_v10, %v413_v24  ;;  %v1219_v24 = vld [vmem:[%s1794_s8] ss:$0 sm:$0xff] }
 0x15a   :  { %v353_v27 = vpop.f32.mrb[0].mxu0 }
 0x15b   :  { %v427_v28 = vadd.f32 %v410_v25, %v353_v27  ;;  %v355_v29 = vpop.f32.mrb[1].mxu0 }
 0x15c   :  { %v428_v31 = vadd.f32 %v414_v26, %v355_v29  ;;  %v357_v32 = vpop.f32.mrb[2].mxu0 }
 0x15d   :  { %v431_v34 = vadd.f32 %v410_v25, %v357_v32  ;;  %v359_v35 = vpop.f32.mrb[3].mxu0  ;;  %v435_v37 = vmax.f32 %v427_v28, 0.0 }
 0x15e   :  { %v432_v36 = vadd.f32 %v414_v26, %v359_v35  ;;  %v436_v40 = vmax.f32 %v428_v31, 0.0 }
 0x15f   :  { %v439_v38 = vmax.f32 %v431_v34, 0.0 }
 0x160   :  { %v440_v41 = vmax.f32 %v432_v36, 0.0 }
 0x161   :  { %v443_v43 = vpack.c.bf16 %v439_v38, %v435_v37 }
 0x162   :  { %v396_v44 = vpop.f32.mrb[4].mxu0  ;;  %v444_v45 = vpack.c.bf16 %v440_v41, %v436_v40 }
 0x163   :  { %v429_v47 = vadd.f32 %v418_v39, %v396_v44  ;;  %v398_v48 = vpop.f32.mrb[5].mxu0 }
 0x164   :  { %v430_v50 = vadd.f32 %v422_v42, %v398_v48  ;;  %v400_v51 = vpop.f32.mrb[6].mxu0  ;;  %875 = vmatprep.mubr.bf16.mxu1 %v444_v45 }
 0x165   :  { %v433_v52 = vadd.f32 %v418_v39, %v400_v51  ;;  %v402_v53 = vpop.f32.mrb[7].mxu0  ;;  %876 = vmatmul.mubr.bf16.vlgmr.msra.gmra.mrb[0].mxu1 %v443_v43  ;;  %v437_v56 = vmax.f32 %v429_v47, 0.0 }
 0x166   :  { %v434_v54 = vadd.f32 %v422_v42, %v402_v53  ;;  %1237 = vmatpush3.bf16.msra.mxu1 %v1411_v46  ;;  %v438_v59 = vmax.f32 %v430_v50, 0.0 }
 0x167   :  { %v441_v57 = vmax.f32 %v433_v52, 0.0  ;;  %1238 = vmatprep.subr.bf16.mxu1 %v1412_v49 }
 0x168   :  { %v442_v60 = vmax.f32 %v434_v54, 0.0 }
 0x169   :  { %v445_v61 = vpack.c.bf16 %v441_v57, %v437_v56 }
 0x16a   :  { %v446_v62 = vpack.c.bf16 %v442_v60, %v438_v59  ;;  %1239 = vmatpush3.bf16.msra.mxu1 %v1413_v55 }
 0x16b   :  { %1240 = vmatprep.subr.bf16.mxu1 %v1414_v58 }
 0x16c   :  { %918 = vmatprep.mubr.bf16.mxu0 %v446_v62 }
 0x16d   :  { %919 = vmatmul.mubr.bf16.vlgmr.msra.gmra.mrb[8].mxu0 %v445_v61 }
 0x16e   :  { %1241 = vmatpush3.bf16.msra.mxu1 %v1415_v63 }
 0x16f   :  { %1242 = vmatprep.subr.bf16.mxu1 %v1416_v0 }
 0x172   :  { %1243 = vmatpush3.bf16.msra.mxu1 %v1417_v1 }
 0x173   :  { %1244 = vmatprep.subr.bf16.mxu1 %v1418_v2 }
 0x176   :  { %1245 = vmatpush3.bf16.msra.mxu1 %v1419_v3 }
 0x177   :  { %1246 = vmatprep.subr.bf16.mxu1 %v1420_v4 }
 0x17a   :  { %1247 = vmatpush3.bf16.msra.mxu1 %v1421_v5 }
 0x17b   :  { %1248 = vmatprep.subr.bf16.mxu1 %v1422_v6 }
 0x17e   :  { %1249 = vmatpush3.bf16.msra.mxu1 %v1423_v7 }
 0x17f   :  { %1250 = vmatprep.subr.bf16.mxu1 %v1424_v8 }
 0x182   :  { %1251 = vmatpush3.bf16.msra.mxu1 %v1425_v9 }
 0x238   :  { %v877_v12 = vpop.f32.mrb[0].mxu1 }
 0x239   :  { %v878_v13 = vadd.f32 %v877_v12, %v516_v11  ;;  %v879_v14 = vpop.f32.mrb[1].mxu1 }
 0x23a   :  { %v881_v15 = vpop.f32.mrb[2].mxu1  ;;  %v880_v19 = vadd.f32 %v879_v14, %v520_v18 }
 0x23b   :  { %v882_v16 = vadd.f32 %v881_v15, %v516_v11  ;;  %v883_v17 = vpop.f32.mrb[3].mxu1 }
 0x23c   :  { %v884_v26 = vadd.f32 %v883_v17, %v520_v18 }
 0x240   :  { %v920_v20 = vpop.f32.mrb[8].mxu0 }
 0x241   :  { %v921_v23 = vadd.f32 %v920_v20, %v878_v13  ;;  %v922_v25 = vpop.f32.mrb[9].mxu0 }
 0x242   :  { %v923_v27 = vadd.f32 %v922_v25, %v880_v19  ;;  %v924_v28 = vpop.f32.mrb[10].mxu0 }
 0x243   :  { %v925_v29 = vadd.f32 %v924_v28, %v882_v16  ;;  %v926_v30 = vpop.f32.mrb[11].mxu0  ;;  %v929_v22 = vmax.f32 %v921_v23, 0.0 }
 0x244   :  { %v927_v31 = vadd.f32 %v926_v30, %v884_v26  ;;  %v930_v33 = vmax.f32 %v923_v27, 0.0 }
 0x245   :  { %v931_v32 = vmax.f32 %v925_v29, 0.0 }
 0x246   :  { %v932_v34 = vmax.f32 %v927_v31, 0.0 }
 0x247   :  { %v933_v35 = vpack.c.bf16 %v931_v32, %v929_v22 }
 0x248   :  { %v934_v36 = vpack.c.bf16 %v932_v34, %v930_v33 }
 0x24a   :  { %1102 = vmatprep.mubr.bf16.mxu1 %v934_v36 }
 0x24b   :  { %1103 = vmatmul.mubr.bf16.vlgmr.msra.gmra.mrb[4].mxu1 %v933_v35 }
 0x31e   :  { %v1252_v21 = vpop.f32.mrb[4].mxu1 }
 0x31f   :  { %v1253_v37 = vpop.f32.mrb[5].mxu1 }
 0x320   :  { %v1254_v38 = vadd.f32 %v1253_v37, %v1252_v21  ;;  %v1255_v39 = vpop.f32.mrb[6].mxu1 }
 0x321   :  { %v1256_v40 = vpop.f32.mrb[7].mxu1 }
 0x322   :  { %v1105_v41 = vadd.f32 %v1254_v38, %v1219_v24  ;;  %v1257_v42 = vadd.f32 %v1256_v40, %v1255_v39 }
 0x324   :  { %1111 = vst [vmem:[#allocation13] sm:$0xff] %v1105_v41  ;;  %v1108_v43 = vadd.f32 %v1257_v42, %v1219_v24 }
 0x326   :  { %1112 = vst [vmem:[#allocation13 + $0x8] sm:$0xff] %v1108_v43 }
 0x327   :  { %1569 = shalt.err (!%p1566_p10)
}
 0x328   :  { %s1570_s24 = scalar_lea.hbm %s1795_s9, 256 }
 0x329   :  { %p1571_p11 = scmp.ne.s32.totalorder %s1795_s9, %s1570_s24  ;;  %p1574_p12 = scmp.lt.u32.totalorder %s1570_s24, %s1795_s9 }
 0x32b   :  { %p1576_p13 = pnand %p1574_p12, %p1571_p11 }
 0x32d   :  { %1579 = shalt.err (!%p1576_p13)
}
 0x32e   :  { %1124 = dma.vmem_to_hbm [thread:$0]  %s1119_s27, 256, %s1795_s9, [#allocation4], %s1599_s2, %s1599_s2, %s1600_s10  }
 0x32f   :  { %1588 = dma.done.wait [#allocation4], 256  }
 0x330   :  { %1589 = vsyncadd [#allocation4], 4294967040 }
 0x331   :  { %1128 = vsyncpa [#allocation3], 1 }
 0x332   :  { %1129 = vsyncpa [#allocation6], 1 }
 0x333   :  { %1130 = vsyncpa [#allocation9], 1 }
 0x334   :  { %1131 = vsyncpa [#allocation12], 1 }
 0x335   :  { %1132 = vsyncpa [#allocation4], 1 }

</bundles_post_ra>
